<compile_context>
chip_gen: v6e
topology: v6e:2x2x1
jax: 0.10.0
libtpu: 0.0.40
codegen_flags: <defaults>
</compile_context>

<pallas_src>
import functools

import jax
import jax.numpy as jnp
from jax.experimental import pallas as pl
from jax.experimental.pallas import tpu as pltpu

NUM_GROUPS = 32
EPS = 1e-6  # matches the PyTorch module (nn.GroupNorm(..., eps=1e-06))


def _group_norm_kernel(x_ref, gamma_ref, beta_ref, o_ref, *, Cg, HW, eps):
    # x_ref / o_ref: (G, Cg*HW)  — all groups of one batch sample, lane-dense
    # gamma_ref / beta_ref: (G, Cg) — resident (constant block index)
    x = x_ref[...].astype(jnp.float32)                     # (G, Cg*HW)

    inv_n = 1.0 / float(Cg * HW)
    s1 = jnp.sum(x, axis=-1, keepdims=True)                # (G, 1)
    s2 = jnp.sum(x * x, axis=-1, keepdims=True)            # (G, 1)
    mean = s1 * inv_n
    # One-pass variance (E[x^2] - mean^2); clamp to guard cancellation.
    var = jnp.maximum(s2 * inv_n - mean * mean, 0.0)
    inv_std = jax.lax.rsqrt(var + eps)                      # (G, 1) — EUP

    # Fold affine into per-(group, channel) scale/shift once on tiny (G, Cg)
    # tensors, then the per-element epilogue is a single FMA per channel slab.
    scale_all = gamma_ref[...] * inv_std                    # (G, Cg)
    shift_all = beta_ref[...] - mean * scale_all            # (G, Cg)

    # Each channel occupies a contiguous, HW-wide (128-aligned here) lane slab
    # of the row, so the (G,1) column broadcast is a cheap lane-broadcast and
    # the store is unmasked.
    for c in range(Cg):                                     # static, small
        sl = slice(c * HW, (c + 1) * HW)
        o_ref[:, sl] = (
            x[:, sl] * scale_all[:, c:c + 1] + shift_all[:, c:c + 1]
        ).astype(o_ref.dtype)


def group_norm(x, gamma, beta, *, num_groups=NUM_GROUPS, eps=EPS):
    """GroupNorm forward: x is (N, C, H, W); gamma/beta are (C,)."""
    N, C, H, W = x.shape
    G = num_groups
    assert C % G == 0, "channels must be divisible by num_groups=32"
    Cg = C // G
    HW = H * W
    row = Cg * HW

    # Free, contiguous reshape of NCHW: one row == one (batch, group).
    x2 = x.reshape(N * G, row)
    gamma2 = gamma.reshape(G, Cg).astype(jnp.float32)
    beta2 = beta.reshape(G, Cg).astype(jnp.float32)

    kernel = functools.partial(_group_norm_kernel, Cg=Cg, HW=HW, eps=eps)

    out = pl.pallas_call(
        kernel,
        out_shape=jax.ShapeDtypeStruct((N * G, row), x.dtype),
        grid_spec=pltpu.PrefetchScalarGridSpec(
            num_scalar_prefetch=0,
            grid=(N,),
            in_specs=[
                # one batch sample (all G groups) per grid step, lane-dense
                pl.BlockSpec((G, row), lambda n: (n, 0)),
                # tiny affine params: constant block index -> DMA'd once
                pl.BlockSpec((G, Cg), lambda n: (0, 0)),
                pl.BlockSpec((G, Cg), lambda n: (0, 0)),
            ],
            out_specs=pl.BlockSpec((G, row), lambda n: (n, 0)),
        ),
        compiler_params=pltpu.CompilerParams(
            dimension_semantics=("parallel",),
        ),
    )(x2, gamma2, beta2)
    return out.reshape(N, C, H, W)


def _reference_group_norm(x, gamma, beta):
    N, C, H, W = x.shape
    G = NUM_GROUPS
    xg = x.reshape(N, G, C // G, H, W).astype(jnp.float32)
    mean = xg.mean(axis=(2, 3, 4), keepdims=True)
    var = ((xg - mean) ** 2).mean(axis=(2, 3, 4), keepdims=True)
    xh = (xg - mean) * jax.lax.rsqrt(var + EPS)
    xh = xh.reshape(N, C, H, W)
    return xh * gamma.reshape(1, C, 1, 1) + beta.reshape(1, C, 1, 1)


if __name__ == "__main__":
    key = jax.random.PRNGKey(0)
    N, C, H, W = 2, 64, 16, 16   # channels divisible by 32 groups

    kx, _ = jax.random.split(key)
    x = jax.random.normal(kx, (N, C, H, W), dtype=jnp.float32)

    # Deterministic affine parameters (exercise the affine path).
    gamma = 1.0 + 0.01 * jnp.arange(C, dtype=jnp.float32)
    beta = 0.001 * jnp.arange(C, dtype=jnp.float32)

    out = group_norm(x, gamma, beta)
    out = jax.block_until_ready(out)

    ref = _reference_group_norm(x, gamma, beta)
    assert jnp.allclose(out, ref, atol=1e-4, rtol=1e-4), "mismatch vs reference"

    print("KERNEL_OK")
</pallas_src>

<mosaic_0001>
module attributes {stable_mosaic.version = 11 : i64} {
  func.func @_group_norm_kernel(%arg0: i32, %arg1: memref<32x512xf32, #tpu.memory_space<vmem>>, %arg2: memref<32x2xf32, #tpu.memory_space<vmem>>, %arg3: memref<32x2xf32, #tpu.memory_space<vmem>>, %arg4: memref<32x512xf32, #tpu.memory_space<vmem>>) attributes {dimension_semantics = [#tpu.dimension_semantics<parallel>], iteration_bounds = array<i64: 2>, scalar_prefetch = 0 : i64, scratch_operands = 0 : i64, tpu.core_type = #tpu.core_type<tc>, window_params = [{transform_indices = @transform_0, window_bounds = array<i64: 32, 512>}, {pipeline_mode = #tpu.pipeline_mode<synchronous>, transform_indices = @transform_1, window_bounds = array<i64: 32, 2>}, {pipeline_mode = #tpu.pipeline_mode<synchronous>, transform_indices = @transform_2, window_bounds = array<i64: 32, 2>}, {transform_indices = @transform_3, window_bounds = array<i64: 32, 512>}]} {
    %c0 = arith.constant 0 : index
    %c0_0 = arith.constant 0 : index
    %0 = vector.load %arg1[%c0, %c0_0] : memref<32x512xf32, #tpu.memory_space<vmem>>, vector<32x512xf32>
    %cst = arith.constant dense<0.000000e+00> : vector<32xf32>
    %1 = vector.multi_reduction <add>, %0, %cst [1] : vector<32x512xf32> to vector<32xf32>
    %2 = vector.shape_cast %1 : vector<32xf32> to vector<32x1xf32>
    %3 = arith.mulf %0, %0 : vector<32x512xf32>
    %cst_1 = arith.constant dense<0.000000e+00> : vector<32xf32>
    %4 = vector.multi_reduction <add>, %3, %cst_1 [1] : vector<32x512xf32> to vector<32xf32>
    %5 = vector.shape_cast %4 : vector<32xf32> to vector<32x1xf32>
    %cst_2 = arith.constant 0.001953125 : f32
    %6 = vector.broadcast %cst_2 : f32 to vector<32x1xf32>
    %7 = arith.mulf %2, %6 : vector<32x1xf32>
    %cst_3 = arith.constant 0.001953125 : f32
    %8 = vector.broadcast %cst_3 : f32 to vector<32x1xf32>
    %9 = arith.mulf %5, %8 : vector<32x1xf32>
    %10 = arith.mulf %7, %7 : vector<32x1xf32>
    %11 = arith.subf %9, %10 : vector<32x1xf32>
    %cst_4 = arith.constant 0.000000e+00 : f32
    %12 = vector.broadcast %cst_4 : f32 to vector<32x1xf32>
    %13 = arith.maximumf %11, %12 : vector<32x1xf32>
    %cst_5 = arith.constant 9.99999997E-7 : f32
    %14 = vector.broadcast %cst_5 : f32 to vector<32x1xf32>
    %15 = arith.addf %13, %14 : vector<32x1xf32>
    %16 = math.rsqrt %15 : vector<32x1xf32>
    %c0_6 = arith.constant 0 : index
    %c0_7 = arith.constant 0 : index
    %17 = vector.load %arg2[%c0_6, %c0_7] : memref<32x2xf32, #tpu.memory_space<vmem>>, vector<32x2xf32>
    %18 = vector.broadcast %16 : vector<32x1xf32> to vector<32x2xf32>
    %19 = arith.mulf %17, %18 : vector<32x2xf32>
    %c0_8 = arith.constant 0 : index
    %c0_9 = arith.constant 0 : index
    %20 = vector.load %arg3[%c0_8, %c0_9] : memref<32x2xf32, #tpu.memory_space<vmem>>, vector<32x2xf32>
    %21 = vector.broadcast %7 : vector<32x1xf32> to vector<32x2xf32>
    %22 = arith.mulf %21, %19 : vector<32x2xf32>
    %23 = arith.subf %20, %22 : vector<32x2xf32>
    %24 = vector.extract_strided_slice %0 {offsets = [0, 0], sizes = [32, 256], strides = [1, 1]} : vector<32x512xf32> to vector<32x256xf32>
    %25 = vector.extract_strided_slice %19 {offsets = [0, 0], sizes = [32, 1], strides = [1, 1]} : vector<32x2xf32> to vector<32x1xf32>
    %26 = vector.broadcast %25 : vector<32x1xf32> to vector<32x256xf32>
    %27 = arith.mulf %24, %26 : vector<32x256xf32>
    %28 = vector.extract_strided_slice %23 {offsets = [0, 0], sizes = [32, 1], strides = [1, 1]} : vector<32x2xf32> to vector<32x1xf32>
    %29 = vector.broadcast %28 : vector<32x1xf32> to vector<32x256xf32>
    %30 = arith.addf %27, %29 : vector<32x256xf32>
    %c0_10 = arith.constant 0 : index
    %c0_11 = arith.constant 0 : index
    %31 = vector.load %arg4[%c0_10, %c0_11] : memref<32x512xf32, #tpu.memory_space<vmem>>, vector<32x256xf32>
    tpu.vector_store %arg4[%c0_10, %c0_11], %30 {strides = array<i32>} : memref<32x512xf32, #tpu.memory_space<vmem>>, vector<32x256xf32>,
    %32 = vector.extract_strided_slice %0 {offsets = [0, 256], sizes = [32, 256], strides = [1, 1]} : vector<32x512xf32> to vector<32x256xf32>
    %33 = vector.extract_strided_slice %19 {offsets = [0, 1], sizes = [32, 1], strides = [1, 1]} : vector<32x2xf32> to vector<32x1xf32>
    %34 = vector.broadcast %33 : vector<32x1xf32> to vector<32x256xf32>
    %35 = arith.mulf %32, %34 : vector<32x256xf32>
    %36 = vector.extract_strided_slice %23 {offsets = [0, 1], sizes = [32, 1], strides = [1, 1]} : vector<32x2xf32> to vector<32x1xf32>
    %37 = vector.broadcast %36 : vector<32x1xf32> to vector<32x256xf32>
    %38 = arith.addf %35, %37 : vector<32x256xf32>
    %c0_12 = arith.constant 0 : index
    %c256 = arith.constant 256 : index
    %39 = vector.load %arg4[%c0_12, %c256] : memref<32x512xf32, #tpu.memory_space<vmem>>, vector<32x256xf32>
    tpu.vector_store %arg4[%c0_12, %c256], %38 {strides = array<i32>} : memref<32x512xf32, #tpu.memory_space<vmem>>, vector<32x256xf32>,
    return
  }
  func.func @transform_0(%arg0: i32) -> (i32, i32) {
    %c0_i32 = arith.constant 0 : i32
    %c0_i32_0 = arith.constant 0 : i32
    return %arg0, %c0_i32 : i32, i32
  }
  func.func @transform_1(%arg0: i32) -> (i32, i32) {
    %c0_i32 = arith.constant 0 : i32
    %c0_i32_0 = arith.constant 0 : i32
    %c0_i32_1 = arith.constant 0 : i32
    return %c0_i32, %c0_i32_0 : i32, i32
  }
  func.func @transform_2(%arg0: i32) -> (i32, i32) {
    %c0_i32 = arith.constant 0 : i32
    %c0_i32_0 = arith.constant 0 : i32
    %c0_i32_1 = arith.constant 0 : i32
    return %c0_i32, %c0_i32_0 : i32, i32
  }
  func.func @transform_3(%arg0: i32) -> (i32, i32) {
    %c0_i32 = arith.constant 0 : i32
    %c0_i32_0 = arith.constant 0 : i32
    return %arg0, %c0_i32 : i32, i32
  }
}

</mosaic_0001>

<bundles_post_ra>
// kernel: tpu_custom_call.1
= control target key start
LH: loop header
LB: loop body
LE: loop exit
PB: predicated region body
PF: predicated region fallthrough
CT: control target
= control target key end

     0   :  { %8 = vsyncpa [#allocation3], 0  ;;  %s1051_s0 = inlined_call_operand.hbm [shape: f32[64,512], index: 0, kind: input, shape index: {}]   ;;  %s1052_s1 = inlined_call_operand.vmem [shape: f32[32,2], index: 1, kind: input, shape index: {}]   ;;  %s1053_s2 = inlined_call_operand.vmem [shape: f32[32,2], index: 2, kind: input, shape index: {}]   ;;  %s1054_s3 = inlined_call_operand.hbm [shape: f32[64,512], index: 3, kind: output, shape index: {}]  }
   0x1   :  { %10 = vsyncpa [#allocation3 + $0x1], 0 }
   0x2   :  { %11 = vsyncpa [#allocation4], 0 }
   0x3   :  { %13 = vsyncpa [#allocation4 + $0x1], 0  ;;  %s728_s12 = smov 0   ;;  %s730_s13 = smov 0  }
   0x4   :  { %s732_s14 = smov 0   ;;  %s734_s15 = smov 0  }
   0x5 LB: > { %s749_s16 = sadd.s32 4294967295, %s698_s15   ;;  %s520_s17 = sadd.s32 4294967294, %s698_s15   ;;  %s698_s15 = sphi %s734_s15, %s1069_s15   ;;  %s694_s14 = sphi %s732_s14, %s1068_s14   ;;  %s690_s13 = sphi %s730_s13, %s1067_s13   ;;  %s686_s12 = sphi %s728_s12, %s1066_s12  }
   0x6   : > { %s753_s18 = sadd.s32 1, %s698_s15   ;;  %s26_s19 = sadd.s32 1, %s694_s14 }
   0x7   : > { %s23_s20 = ssub.s32 %s698_s15, %s753_s18  ;;  %p33_p0 = scmp.ne.s32.totalorder %s694_s14, %s690_s13 }
   0x8   : > { %p24_p1 = scmp.eq.s32.totalorder %s23_s20, 0  ;;  %p34_p2 = scmp.eq.s32.totalorder %s698_s15, 0 }
   0x9   : > { %p39_p3 = scmp.ne.s32.totalorder %s690_s13, %s686_s12  ;;  %p40_p4 = scmp.eq.s32.totalorder %s749_s16, 0 }
   0xa   : > { %s765_s21 = scalar_select %p24_p1, %s694_s14, %s26_s19  }
   0xb   : > { %p767_p5 = por %p34_p2, %p33_p0  ;;  %p771_p6 = por %p40_p4, %p39_p3 }
   0xc   : > { %p105_p7 = scmp.eq.s32.totalorder %s749_s16, 1  ;;  %p111_p8 = scmp.eq.s32.totalorder %s520_s17, 1 }
   0xd   : > { %s1058_s23 = scalar_select %p771_p6, 1, 0 }
   0xe   : > { %p552_p10 = scmp.lt.s32.totalorder %s698_s15, 2  ;;  %p778_p11 = por %p105_p7, %p33_p0 }
   0xf   : > { %p782_p12 = por %p111_p8, %p39_p3  ;;  %s137_s26 = sand.u32 1, %s694_s14  }
  0x10   : > { %s1059_s24 = scalar_select %p778_p11, 1, 0 }
  0x11   : > { %s1060_s25 = scalar_select %p782_p12, 1, 0 }
  0x12   : > { %s537_s27 = sshll.u32 %s698_s15, 11  ;;  %s523_s28 = sshll.u32 %s137_s26, 7 }
  0x13   : > { %s791_s4 = scalar_lea.hbm %s1051_s0, %s537_s27  ;;  %s141_s5 = scalar_lea.vmem [#allocation2], %s523_s28 }
  0x14   : > { %s149_s6 = sshll.u32 %s141_s5, 4  ;;  %p795_p13 = pnand %p552_p10, %p767_p5  ;;  %s799_s6 = int_to_ptr.vmem [resolvable:$true] %s149_s6 }
  0x15   : > { %s801_s8 = scalar_lea.sflag [#allocation3], %s137_s26  ;;  %s606_s9 = scalar_lea.hbm %s791_s4, 2048 }
  0x16   : > { %p607_p0 = scmp.ne.s32.totalorder %s791_s4, %s606_s9  ;;  %p608_p1 = pneg %p795_p13 }
  0x17   : > { %s611_s17 = scalar_lea.hbm %s1051_s0, 4096  ;;  %p612_p4 = scmp.lt.s32.totalorder %s791_s4, %s1051_s0 }
  0x18   : > { %p609_p2 = pnand %p608_p1, %p607_p0  ;;  %p613_p5 = scmp.lt.s32.totalorder %s611_s17, %s606_s9 }
  0x1a   : > { %p610_p3 = pneg %p609_p2  ;;  %p614_p7 = por %p613_p5, %p612_p4 }
  0x1c   : > { %p615_p8 = pnand %p614_p7, %p610_p3 }
  0x1e   : > { %618 = shalt.err (!%p615_p8)
}
  0x1f   : > { %s619_s22 = scalar_lea.vmem %s799_s6, 2048  ;;  %s700_s26 = smov [#allocation2]  }
  0x20   : > { %p620_p10 = scmp.ne.s32.totalorder %s799_s6, %s619_s22  ;;  %s624_s27 = sshll.u32 %s700_s26, 4  ;;  %s625_s27 = int_to_ptr.vmem [resolvable:$false] %s624_s27 }
  0x21   : > { %s626_s28 = scalar_lea.vmem %s625_s27, 4096  ;;  %p627_p2 = scmp.lt.s32.totalorder %s799_s6, %s625_s27 }
  0x22   : > { %p622_p9 = pnand %p620_p10, %p608_p1  ;;  %p628_p12 = scmp.lt.s32.totalorder %s626_s28, %s619_s22 }
  0x24   : > { %p623_p0 = pneg %p622_p9  ;;  %p629_p11 = por %p628_p12, %p627_p2 }
  0x26   : > { %p630_p6 = pnand %p629_p11, %p623_p0 }
  0x28   : > { %633 = shalt.err (!%p630_p6)
}
  0x29   : > { %s701_s29 = smov 512   ;;  %s702_s30 = smov 32  }
  0x2a   : > { %547 = dma.hbm_to_vmem [thread:$0]  (!%p795_p13), %s791_s4, 2048, %s799_s6, %s801_s8, %s701_s29, %s701_s29, %s702_s30  }
  0x2b   : > { %p527_p9 = scmp.ge.s32.totalorder %s698_s15, 1  ;;  %p157_p1 = scmp.lt.s32.totalorder %s698_s15, 3 }
  0x2d   : > { %p158_p3 = pnand %p527_p9, %p157_p1 }
  0x2e   : > { %s825_s5 = sand.u32 (!%p158_p3), 1, %s690_s13   ;;  %p1062_p6 = scmp.ne.s32.totalorder (!%p158_p3), %s1058_s23, 0 }
  0x2f   : > { %161 = sbr.rel (%p158_p3) target bundleno = 418 (0x1a2), region = 32  ;;  %s528_s9 = sshll.u32 (!%p158_p3), %s825_s5, 7 }
  0x30   : > { %s164_s10 = scalar_lea.sflag (!%p158_p3), [#allocation3], %s825_s5  ;;  %s831_s11 = scalar_lea.vmem (!%p158_p3), [#allocation2], %s528_s9 }
  0x34   : > { %677 = dma.done.wait (%p1062_p6), %s164_s10, 2048  }
  0x35   : > { %679 = vsyncadd (%p1062_p6), %s164_s10, 4294965248  ;;  %v838_v0 = vld [vmem:[%s831_s11 + $0x40] sm:$0xff]  ;;  %v841_v1 = vld [vmem:[%s831_s11 + $0x48] sm:$0xff]  ;;  %v703_v56 = vmov 0   ;;  %s969_s23 = scalar_lea.vmem [#allocation5], %s528_s9  ;;  %s539_s9 = sshll.u32 %s749_s16, 11 }
  0x36   : > { %v844_v2 = vld [vmem:[%s831_s11 + $0x50] sm:$0xff]  ;;  %v218_v3 = vadd.f32 %v841_v1, %v838_v0  ;;  %v849_v4 = vld [vmem:[%s831_s11] sm:$0xff]  ;;  %v852_v5 = vld [vmem:[%s831_s11 + $0x8] sm:$0xff]  ;;  %v236_v6 = vmul.f32 %v838_v0, %v838_v0  ;;  %v237_v13 = vmul.f32 %v841_v1, %v841_v1  ;;  %593 = vset.pattern.permute.xlu1 %v703_v56  ;;  %592 = vset.pattern.permute.xlu0 %v703_v56  ;;  %s447_s4 = sshll.u32 %s969_s23, 4  ;;  %s1004_s8 = scalar_lea.hbm %s1054_s3, %s539_s9  ;;  %s1006_s4 = int_to_ptr.vmem [resolvable:$true] %s447_s4 }
  0x37   : > { %v857_v7 = vld [vmem:[%s831_s11 + $0x58] sm:$0xff]  ;;  %v860_v8 = vld [vmem:[%s831_s11 + $0x10] sm:$0xff]  ;;  %v208_v9 = vadd.f32 %v852_v5, %v849_v4  ;;  %v865_v10 = vld [vmem:[%s831_s11 + $0x60] sm:$0xff]  ;;  %v228_v11 = vmul.f32 %v849_v4, %v849_v4  ;;  %v229_v12 = vmul.f32 %v852_v5, %v852_v5  ;;  %v238_v20 = vmul.f32 %v844_v2, %v844_v2  ;;  %s433_s16 = scalar_lea.sflag [#allocation4], %s825_s5  ;;  %s634_s17 = scalar_lea.vmem %s1006_s4, 2048 }
  0x38   : > { %v219_v14 = vadd.f32 %v218_v3, %v844_v2  ;;  %v875_v15 = vld [vmem:[%s831_s11 + $0x18] sm:$0xff]  ;;  %v878_v16 = vld [vmem:[%s831_s11 + $0x68] sm:$0xff]  ;;  %v881_v17 = vld [vmem:[%s831_s11 + $0x70] sm:$0xff]  ;;  %v230_v18 = vmul.f32 %v860_v8, %v860_v8  ;;  %v240_v19 = vmul.f32 %v865_v10, %v865_v10  ;;  %v254_v45 = vadd.f32 %v237_v13, %v236_v6  ;;  %p635_p11 = scmp.ne.s32.totalorder %s1006_s4, %s634_s17  ;;  %p1063_p12 = scmp.ne.s32.totalorder %s1059_s24, 0 }
  0x39   : > { %v209_v21 = vadd.f32 %v208_v9, %v860_v8  ;;  %v223_v22 = vadd.f32 %v878_v16, %v865_v10  ;;  %v893_v23 = vld [vmem:[%s831_s11 + $0x20] sm:$0xff]  ;;  %v896_v24 = vld [vmem:[%s831_s11 + $0x28] sm:$0xff]  ;;  %v899_v25 = vld [vmem:[%s831_s11 + $0x30] sm:$0xff]  ;;  %v244_v26 = vadd.f32 %v229_v12, %v228_v11  ;;  %v241_v27 = vmul.f32 %v878_v16, %v878_v16  ;;  %s705_s19 = smov [#allocation5]  }
  0x3a   : > { %v220_v28 = vadd.f32 %v219_v14, %v857_v7  ;;  %v905_v29 = vld [vmem:[%s831_s11 + $0x78] sm:$0xff]  ;;  %v213_v30 = vadd.f32 %v896_v24, %v893_v23  ;;  %v232_v31 = vmul.f32 %v893_v23, %v893_v23  ;;  %v233_v32 = vmul.f32 %v896_v24, %v896_v24  ;;  %p636_p13 = pnand %p635_p11, %p1063_p12  ;;  %s638_s20 = sshll.u32 %s705_s19, 4  ;;  %s639_s20 = int_to_ptr.vmem [resolvable:$false] %s638_s20 }
  0x3b   : > { %v210_v33 = vadd.f32 %v209_v21, %v875_v15  ;;  %v224_v34 = vadd.f32 %v223_v22, %v881_v17  ;;  %v916_v35 = vld [vmem:[%s831_s11 + $0x38] sm:$0xff]  ;;  %v234_v36 = vmul.f32 %v899_v25, %v899_v25  ;;  %v231_v37 = vmul.f32 %v875_v15, %v875_v15  ;;  %s640_s22 = scalar_lea.vmem %s639_s20, 4096  ;;  %p641_p5 = scmp.lt.s32.totalorder %s1006_s4, %s639_s20 }
  0x3c   : > { %221 = vadd.xlane.f32.xlu1 %v220_v28  ;;  %v214_v38 = vadd.f32 %v213_v30, %v899_v25  ;;  %v235_v39 = vmul.f32 %v916_v35, %v916_v35  ;;  %v249_v40 = vadd.f32 %v233_v32, %v232_v31  ;;  %v242_v41 = vmul.f32 %v881_v17, %v881_v17  ;;  %p637_p4 = pneg %p636_p13  ;;  %p642_p7 = scmp.lt.s32.totalorder %s640_s22, %s634_s17 }
  0x3d   : > { %211 = vadd.xlane.f32.xlu0 %v210_v33  ;;  %v225_v42 = vadd.f32 %v224_v34, %v905_v29  ;;  %v245_v43 = vadd.f32 %v244_v26, %v230_v18  ;;  %v259_v44 = vadd.f32 %v241_v27, %v240_v19  ;;  %v243_v49 = vmul.f32 %v905_v29, %v905_v29 }
  0x3e   : > { %v215_v46 = vadd.f32 %v214_v38, %v916_v35  ;;  %v250_v47 = vadd.f32 %v249_v40, %v234_v36  ;;  %v239_v52 = vmul.f32 %v857_v7, %v857_v7  ;;  %v255_v53 = vadd.f32 %v254_v45, %v238_v20  ;;  %p643_p8 = por %p642_p7, %p641_p5 }
  0x3f   : > { %v260_v50 = vadd.f32 %v259_v44, %v242_v41  ;;  %v246_v51 = vadd.f32 %v245_v43, %v231_v37  ;;  %v293_v41 = vld [vmem:[%s1052_s1 + $0x8] sm:$0xff] }
  0x40   : > { %226 = vadd.xlane.f32.xlu1 %v225_v42  ;;  %v251_v48 = vadd.f32 %v250_v47, %v235_v39  ;;  %v256_v55 = vadd.f32 %v255_v53, %v239_v52  ;;  %v292_v42 = vld [vmem:[%s1052_s1] sm:$0xff]  ;;  %v301_v47 = vld [vmem:[%s1053_s2 + $0x8] sm:$0xff]  ;;  %p644_p10 = pnand %p643_p8, %p637_p4 }
  0x41   : > { %216 = vadd.xlane.f32.xlu0 %v215_v46  ;;  %v261_v54 = vadd.f32 %v260_v50, %v243_v49  ;;  %v294_v50 = vld [vmem:[%s1052_s1 + $0x10] sm:$0xff] }
  0x44   : > { %252 = vadd.xlane.f32.xlu1 %v251_v48  ;;  %v295_v48 = vld [vmem:[%s1052_s1 + $0x18] sm:$0xff] }
  0x45   : > { %247 = vadd.xlane.f32.xlu0 %v246_v51 }
  0x48   : > { %262 = vadd.xlane.f32.xlu1 %v261_v54 }
  0x49   : > { %257 = vadd.xlane.f32.xlu0 %v256_v55 }
  0xc5   : > { %v222_v57 = vpop.xlane.xlu1 %221 }
  0xc6   : > { %v212_v58 = vpop.xlane.xlu0 %211  ;;  %v266_v12 = vmul.f32 0.001953125, %v222_v57  ;;  %v303_v57 = vld [vmem:[%s1053_s2 + $0x18] sm:$0xff] }
  0xc7   : > { %v935_v61 = vmul.f32 0.001953125, %v212_v58 }
  0xc8   : > { %v274_v28 = vmul.f32 %v266_v12, %v266_v12 }
  0xc9   : > { %v227_v59 = vpop.xlane.xlu1 %226  ;;  %v272_v13 = vmul.f32 %v935_v61, %v935_v61 }
  0xca   : > { %v217_v60 = vpop.xlane.xlu0 %216  ;;  %v267_v3 = vmul.f32 0.001953125, %v227_v59 }
  0xcb   : > { %v265_v62 = vmul.f32 0.001953125, %v217_v60  ;;  %v704_v60 = vmov 1  }
  0xcc   : > { %v275_v21 = vmul.f32 %v267_v3, %v267_v3 }
  0xcd   : > { %v253_v63 = vpop.xlane.xlu1 %252  ;;  %v273_v6 = vmul.f32 %v265_v62, %v265_v62 }
  0xce   : > { %v269_v9 = vmul.f32 0.001953125, %v253_v63  ;;  %v248_v11 = vpop.xlane.xlu0 %247  ;;  %v300_v63 = vld [vmem:[%s1053_s2] sm:$0xff] }
  0xcf   : > { %v268_v14 = vmul.f32 0.001953125, %v248_v11 }
  0xd0   : > { %v277_v18 = vsub.f32 %v269_v9, %v273_v6  ;;  %v302_v9 = vld [vmem:[%s1053_s2 + $0x10] sm:$0xff] }
  0xd1   : > { %v276_v19 = vsub.f32 %v268_v14, %v272_v13  ;;  %v263_v20 = vpop.xlane.xlu1 %262 }
  0xd2   : > { %v281_v22 = vmax.f32 %v277_v18, 0.0  ;;  %v271_v26 = vmul.f32 0.001953125, %v263_v20  ;;  %v258_v27 = vpop.xlane.xlu0 %257 }
  0xd3   : > { %v280_v30 = vmax.f32 %v276_v19, 0.0  ;;  %v270_v31 = vmul.f32 0.001953125, %v258_v27 }
  0xd4   : > { %v285_v32 = vadd.f32 1e-06, %v281_v22  ;;  %v279_v33 = vsub.f32 %v271_v26, %v275_v21 }
  0xd5   : > { %v284_v34 = vadd.f32 1e-06, %v280_v30  ;;  %v278_v36 = vsub.f32 %v270_v31, %v274_v28 }
  0xd6   : > { %598 = vrsqrt.f32 %v285_v32  ;;  %v283_v37 = vmax.f32 %v279_v33, 0.0 }
  0xd7   : > { %600 = vrsqrt.f32 %v284_v34  ;;  %v282_v38 = vmax.f32 %v278_v36, 0.0 }
  0xd8   : > { %v287_v39 = vadd.f32 1e-06, %v283_v37 }
  0xd9   : > { %v286_v40 = vadd.f32 1e-06, %v282_v38 }
  0xda   : > { %602 = vrsqrt.f32 %v287_v39 }
  0xdb   : > { %604 = vrsqrt.f32 %v286_v40 }
  0xe3   : > { %v599_v43 = vpop.eup %598 }
  0xe4   : > { %v601_v44 = vpop.eup %600  ;;  %v297_v45 = vmul.f32 %v599_v43, %v293_v41 }
  0xe5   : > { %v296_v46 = vmul.f32 %v601_v44, %v292_v42 }
  0xe6   : > { %319 = vperm.xlu1 %593, %v297_v45   ;;  %v305_v49 = vmul.f32 %v297_v45, %v265_v62 }
  0xe7   : > { %v603_v51 = vpop.eup %602  ;;  %314 = vperm.xlu0 %592, %v296_v46   ;;  %v304_v62 = vmul.f32 %v296_v46, %v935_v61 }
  0xe8   : > { %v605_v52 = vpop.eup %604  ;;  %v309_v53 = vsub.f32 %v301_v47, %v305_v49  ;;  %v299_v54 = vmul.f32 %v603_v51, %v295_v48 }
  0xe9   : > { %v298_v55 = vmul.f32 %v605_v52, %v294_v50 }
  0xea   : > { %v307_v58 = vmul.f32 %v299_v54, %v267_v3  ;;  %v308_v3 = vsub.f32 %v300_v63, %v304_v62 }
  0xeb   : > { %347 = vperm.xlu0 %592, %v309_v53   ;;  %324 = vperm.xlu1 %593, %v298_v55   ;;  %v306_v6 = vmul.f32 %v298_v55, %v266_v12 }
  0xec   : > { %v311_v59 = vsub.f32 %v303_v57, %v307_v58 }
  0xed   : > { %v310_v11 = vsub.f32 %v302_v9, %v306_v6 }
  0xef   : > { %357 = vperm.xlu0 %592, %v311_v59   ;;  %329 = vperm.xlu1 %593, %v299_v54  }
  0xf3   : > { %597 = vset.pattern.permute.xlu0 %v704_v60  ;;  %594 = vset.pattern.permute.xlu1 %v704_v60 }
  0xf4   : > { %405 = vperm.xlu0 %597, %v309_v53   ;;  %377 = vperm.xlu1 %594, %v296_v46  }
  0xf8   : > { %381 = vperm.xlu1 %594, %v297_v45  }
  0xfc   : > { %385 = vperm.xlu1 %594, %v298_v55  }
 0x100   : > { %389 = vperm.xlu1 %594, %v299_v54  }
 0x104   : > { %595 = vset.pattern.permute.xlu1 %v703_v56 }
 0x105   : > { %342 = vperm.xlu1 %595, %v308_v3  }
 0x109   : > { %352 = vperm.xlu1 %595, %v310_v11  }
 0x10d   : > { %596 = vset.pattern.permute.xlu1 %v704_v60 }
 0x10e   : > { %401 = vperm.xlu1 %596, %v308_v3  }
 0x112   : > { %409 = vperm.xlu1 %596, %v310_v11  }
 0x116   : > { %413 = vperm.xlu1 %596, %v311_v59  }
 0x161   : > { %v320_v61 = vpop.permute.xlu1 %319 }
 0x162   : > { %v315_v13 = vpop.permute.xlu0 %314  ;;  %v334_v14 = vmul.f32 %v320_v61, %v893_v23  ;;  %v335_v12 = vmul.f32 %v320_v61, %v896_v24 }
 0x163   : > { %v332_v37 = vmul.f32 %v315_v13, %v849_v4  ;;  %v333_v38 = vmul.f32 %v315_v13, %v852_v5 }
 0x166   : > { %v325_v18 = vpop.permute.xlu1 %324  ;;  %v348_v56 = vpop.permute.xlu0 %347 }
 0x167   : > { %v362_v19 = vadd.f32 %v348_v56, %v334_v14  ;;  %v363_v20 = vadd.f32 %v348_v56, %v335_v12  ;;  %v336_v41 = vmul.f32 %v325_v18, %v838_v0 }
 0x169   : > { %370 = vst [vmem:[%s969_s23 + $0x20] sm:$0xff] %v362_v19  ;;  %371 = vst [vmem:[%s969_s23 + $0x28] sm:$0xff] %v363_v20 }
 0x16a   : > { %v330_v21 = vpop.permute.xlu1 %329  ;;  %v358_v24 = vpop.permute.xlu0 %357 }
 0x16b   : > { %v338_v22 = vmul.f32 %v330_v21, %v865_v10  ;;  %v339_v23 = vmul.f32 %v330_v21, %v878_v16 }
 0x16d   : > { %v366_v26 = vadd.f32 %v358_v24, %v338_v22  ;;  %v367_v27 = vadd.f32 %v358_v24, %v339_v23 }
 0x16f   : > { %374 = vst [vmem:[%s969_s23 + $0x60] sm:$0xff] %v366_v26  ;;  %375 = vst [vmem:[%s969_s23 + $0x68] sm:$0xff] %v367_v27  ;;  %v378_v28 = vpop.permute.xlu1 %377  ;;  %v406_v33 = vpop.permute.xlu0 %405 }
 0x170   : > { %v392_v4 = vmul.f32 %v378_v28, %v860_v8  ;;  %v393_v5 = vmul.f32 %v378_v28, %v875_v15 }
 0x173   : > { %v382_v30 = vpop.permute.xlu1 %381 }
 0x174   : > { %v394_v31 = vmul.f32 %v382_v30, %v899_v25  ;;  %v395_v32 = vmul.f32 %v382_v30, %v916_v35  ;;  %v337_v35 = vmul.f32 %v325_v18, %v841_v1 }
 0x176   : > { %v418_v34 = vadd.f32 %v406_v33, %v394_v31  ;;  %v419_v36 = vadd.f32 %v406_v33, %v395_v32 }
 0x177   : > { %v386_v10 = vpop.permute.xlu1 %385 }
 0x178   : > { %426 = vst [vmem:[%s969_s23 + $0x30] sm:$0xff] %v418_v34  ;;  %427 = vst [vmem:[%s969_s23 + $0x38] sm:$0xff] %v419_v36  ;;  %v396_v1 = vmul.f32 %v386_v10, %v844_v2  ;;  %v397_v47 = vmul.f32 %v386_v10, %v857_v7 }
 0x17b   : > { %v390_v16 = vpop.permute.xlu1 %389 }
 0x17c   : > { %v398_v8 = vmul.f32 %v390_v16, %v881_v17  ;;  %v399_v15 = vmul.f32 %v390_v16, %v905_v29 }
 0x180   : > { %v343_v39 = vpop.permute.xlu1 %342 }
 0x181   : > { %v360_v40 = vadd.f32 %v343_v39, %v332_v37  ;;  %v361_v25 = vadd.f32 %v343_v39, %v333_v38 }
 0x183   : > { %368 = vst [vmem:[%s969_s23] sm:$0xff] %v360_v40  ;;  %369 = vst [vmem:[%s969_s23 + $0x8] sm:$0xff] %v361_v25 }
 0x184   : > { %v353_v42 = vpop.permute.xlu1 %352 }
 0x185   : > { %v364_v43 = vadd.f32 %v353_v42, %v336_v41  ;;  %v365_v44 = vadd.f32 %v353_v42, %v337_v35 }
 0x187   : > { %372 = vst [vmem:[%s969_s23 + $0x40] sm:$0xff] %v364_v43  ;;  %373 = vst [vmem:[%s969_s23 + $0x48] sm:$0xff] %v365_v44 }
 0x189   : > { %v402_v0 = vpop.permute.xlu1 %401 }
 0x18a   : > { %v416_v45 = vadd.f32 %v402_v0, %v392_v4  ;;  %v417_v46 = vadd.f32 %v402_v0, %v393_v5 }
 0x18c   : > { %424 = vst [vmem:[%s969_s23 + $0x10] sm:$0xff] %v416_v45  ;;  %425 = vst [vmem:[%s969_s23 + $0x18] sm:$0xff] %v417_v46 }
 0x18d   : > { %v410_v48 = vpop.permute.xlu1 %409 }
 0x18e   : > { %v420_v49 = vadd.f32 %v410_v48, %v396_v1  ;;  %v421_v50 = vadd.f32 %v410_v48, %v397_v47 }
 0x190   : > { %428 = vst [vmem:[%s969_s23 + $0x50] sm:$0xff] %v420_v49  ;;  %429 = vst [vmem:[%s969_s23 + $0x58] sm:$0xff] %v421_v50 }
 0x191   : > { %v414_v2 = vpop.permute.xlu1 %413 }
 0x192   : > { %v422_v7 = vadd.f32 %v414_v2, %v398_v8  ;;  %v423_v51 = vadd.f32 %v414_v2, %v399_v15 }
 0x194   : > { %430 = vst [vmem:[%s969_s23 + $0x70] sm:$0xff] %v422_v7  ;;  %431 = vst [vmem:[%s969_s23 + $0x78] sm:$0xff] %v423_v51 }
 0x195   : > { %647 = shalt.err (!%p644_p10)
}
 0x196   : > { %s648_s26 = scalar_lea.hbm %s1004_s8, 2048  ;;  %s652_s29 = scalar_lea.hbm %s1054_s3, 4096 }
 0x197   : > { %p649_p0 = scmp.ne.s32.totalorder %s1004_s8, %s648_s26  ;;  %p653_p1 = scmp.lt.s32.totalorder %s1004_s8, %s1054_s3 }
 0x198   : > { %p654_p3 = scmp.lt.s32.totalorder %s652_s29, %s648_s26 }
 0x199   : > { %p650_p2 = pnand %p649_p0, %p1063_p12 }
 0x19a   : > { %p655_p6 = por %p654_p3, %p653_p1 }
 0x19b   : > { %p651_p9 = pneg %p650_p2 }
 0x19d   : > { %p656_p11 = pnand %p655_p6, %p651_p9 }
 0x19f   : > { %659 = shalt.err (!%p656_p11)
}
 0x1a0   : > { %s706_s11 = smov 512   ;;  %s707_s23 = smov 32  }
 0x1a1   : > { %542 = dma.vmem_to_hbm [thread:$0]  (%p1063_p12), %s1006_s4, 2048, %s1004_s8, %s433_s16, %s706_s11, %s706_s11, %s707_s23  }
 0x1a2 PF: > { %s462_s9 = sand.u32 1, %s686_s12   ;;  %p1064_p13 = scmp.ne.s32.totalorder %s1060_s25, 0 }
 0x1a3   : > { %p1065_p4 = scmp.ge.s32.totalorder %s698_s15, 2  ;;  %s463_s6 = scalar_lea.sflag [#allocation4], %s462_s9 }
 0x1a5   : > { %p549_p5 = pnand %p1065_p4, %p1064_p13 }
 0x1a7   : > { %p550_p7 = pneg %p549_p5 }
 0x1a9   : > { %681 = dma.done.wait (%p550_p7), %s463_s6, 2048  }
 0x1aa   : > { %683 = vsyncadd (%p550_p7), %s463_s6, 4294965248  ;;  %p16_p8 = scmp.ge.s32.totalorder %s753_s18, 4   ;;  %s1066_s12 = smov %s690_s13 }
 0x1ab   : > { %s1067_s13 = smov %s694_s14  ;;  %s1068_s14 = smov %s765_s21 }
 0x1ac   : > { %s1069_s15 = smov %s753_s18  ;;  %18 = sbr.rel (!%p16_p8) target bundleno = 5 (0x5), region = 77 }
 0x1b1   :  { %468 = vsyncpa [#allocation3], 1 }
 0x1b2   :  { %470 = vsyncpa [#allocation3 + $0x1], 1 }
 0x1b3   :  { %471 = vsyncpa [#allocation4], 1 }
 0x1b4   :  { %473 = vsyncpa [#allocation4 + $0x1], 1 }

</bundles_post_ra>
